<compile_context>
chip_gen: v6e
topology: v6e:2x2x1
jax: 0.10.0
libtpu: 0.0.40
codegen_flags: <defaults>
</compile_context>

<pallas_src>
import functools

import jax
import jax.numpy as jnp
from jax import lax
from jax.experimental import pallas as pl
from jax.experimental.pallas import tpu as pltpu


def kv_kernel(ids_ref, emb_ref, w_ref, b_ref, out_ref):
    # ids_ref: VMEM [tb, S] int32
    # emb_ref: VMEM [V, D]   embedding table
    # w_ref:   VMEM [D, C]   Linear weight^T with eval-BN scale folded in
    # b_ref:   VMEM [1, C]   Linear bias with eval-BN folded in
    # out_ref: VMEM [tb, C]
    ids = ids_ref[...]
    tb, seq = ids.shape
    vocab = emb_ref.shape[0]

    # One-hot token counts on the VPU: counts[r, v] = #{s : ids[r, s] == v}.
    onehot = (ids[:, :, None] ==
              lax.broadcasted_iota(jnp.int32, (tb, seq, vocab), 2))
    counts = jnp.sum(onehot.astype(jnp.float32), axis=1)          # [tb, V]

    # EmbeddingBag(mode='mean'): (counts @ table) / S on the MXU. counts are
    # exact small integers, so the row-sum is exact; 1/S gives the mean.
    bag = jnp.dot(counts.astype(emb_ref.dtype), emb_ref[...],
                  preferred_element_type=jnp.float32,
                  precision=lax.Precision.HIGHEST) * (1.0 / seq)  # [tb, D]

    # Linear + folded eval-mode BatchNorm1d: one more MXU matmul + bias add.
    out_ref[...] = (
        jnp.dot(bag.astype(w_ref.dtype), w_ref[...],
                preferred_element_type=jnp.float32,
                precision=lax.Precision.HIGHEST)
        + b_ref[...]
    ).astype(out_ref.dtype)


def key_value_network_forward(token_ids, emb_table, w, b, gamma, beta,
                              running_mean, running_var, *, eps=1e-5, tb=8,
                              param_dtype=jnp.float32):
    """token_ids: [B, S] int32; emb_table: [V, D]; w: [D, C] (Linear weight^T);
    b / gamma / beta / running_mean / running_var: [1, C]."""
    B, S = token_ids.shape
    V, D = emb_table.shape
    C = w.shape[1]
    assert B % tb == 0, "batch must be divisible by the batch tile"

    # Fold eval-mode BatchNorm1d into the Linear weight / bias (exact at
    # inference; dropout is identity).
    inv_std = lax.rsqrt(running_var + eps)                  # [1, C]
    scale = gamma * inv_std                                 # [1, C]
    w_eff = (w * scale).astype(param_dtype)                 # [D, C]
    b_eff = ((b - running_mean) * scale + beta).astype(jnp.float32)   # [1, C]
    emb = emb_table.astype(param_dtype)                     # [V, D]

    grid = (B // tb,)
    flops = 2 * B * V * D + 2 * B * D * C
    itemsize = jnp.dtype(param_dtype).itemsize
    bytes_accessed = (token_ids.size * 4 + emb.size * itemsize
                      + w_eff.size * itemsize + b_eff.size * 4 + B * C * 4)

    return pl.pallas_call(
        kv_kernel,
        out_shape=jax.ShapeDtypeStruct((B, C), jnp.float32),
        grid=grid,
        in_specs=[
            pl.BlockSpec((tb, S), lambda i: (i, 0)),        # token ids tile
            # Constant block index -> DMA'd once, stays VMEM-resident.
            pl.BlockSpec((V, D), lambda i: (0, 0)),
            pl.BlockSpec((D, C), lambda i: (0, 0)),
            pl.BlockSpec((1, C), lambda i: (0, 0)),
        ],
        out_specs=pl.BlockSpec((tb, C), lambda i: (i, 0)),
        compiler_params=pltpu.CompilerParams(
            dimension_semantics=("parallel",),              # batch tiles independent
            vmem_limit_bytes=32 * 1024 * 1024,
        ),
        cost_estimate=pl.CostEstimate(flops=flops, transcendentals=0,
                                      bytes_accessed=bytes_accessed),
    )(token_ids.astype(jnp.int32), emb, w_eff, b_eff)


def reference_forward(token_ids, emb_table, w, b, gamma, beta,
                      running_mean, running_var, eps=1e-5):
    emb_seq = jnp.take(emb_table, token_ids, axis=0)        # [B, S, D]
    bag = jnp.mean(emb_seq, axis=1)                         # [B, D]
    logits = jnp.dot(bag, w, precision=lax.Precision.HIGHEST) + b   # [B, C]
    inv_std = lax.rsqrt(running_var + eps)
    return (logits - running_mean) * inv_std * gamma + beta


if __name__ == "__main__":
    # Small, lane-friendly shapes consistent with the module:
    #   vocab_size=64, embedding_dim=128, n_classes=128, batch=32, seq_len=8
    B, S, V, D, C = 32, 8, 64, 128, 128
    TB = 8                                                   # grid=(4,): >=2 steps for v7x's 2 TCs

    key = jax.random.PRNGKey(0)
    k_ids, k_emb, k_w, k_b, k_g, k_be, k_rm, k_rv = jax.random.split(key, 8)

    token_ids = jax.random.randint(k_ids, (B, S), 0, V, dtype=jnp.int32)

    # Deterministic synthetic parameters (shapes per __init__).
    emb_table = jax.random.normal(k_emb, (V, D), dtype=jnp.float32) * 0.1
    w = jax.random.normal(k_w, (D, C), dtype=jnp.float32) * 0.05      # Linear weight^T
    b = jax.random.normal(k_b, (1, C), dtype=jnp.float32) * 0.01      # Linear bias
    gamma = 1.0 + 0.1 * jax.random.normal(k_g, (1, C), dtype=jnp.float32)   # BN weight
    beta = 0.1 * jax.random.normal(k_be, (1, C), dtype=jnp.float32)         # BN bias
    running_mean = 0.01 * jax.random.normal(k_rm, (1, C), dtype=jnp.float32)
    running_var = 1.0 + 0.1 * jax.random.uniform(k_rv, (1, C), dtype=jnp.float32)

    fwd = jax.jit(functools.partial(key_value_network_forward, tb=TB))
    out = fwd(token_ids, emb_table, w, b, gamma, beta, running_mean, running_var)
    out = jax.block_until_ready(out)

    ref = reference_forward(token_ids, emb_table, w, b, gamma, beta,
                            running_mean, running_var)
    assert out.shape == (B, C)
    assert jnp.allclose(out, ref, atol=1e-4, rtol=1e-4), \
        float(jnp.max(jnp.abs(out - ref)))

    print("KERNEL_OK")
</pallas_src>

<mosaic_0001>
module attributes {stable_mosaic.version = 11 : i64} {
  func.func @kv_kernel(%arg0: i32, %arg1: memref<8x8xi32, #tpu.memory_space<vmem>>, %arg2: memref<64x128xf32, #tpu.memory_space<vmem>>, %arg3: memref<128x128xf32, #tpu.memory_space<vmem>>, %arg4: memref<1x128xf32, #tpu.memory_space<vmem>>, %arg5: memref<8x128xf32, #tpu.memory_space<vmem>>) attributes {dimension_semantics = [#tpu.dimension_semantics<parallel>], iteration_bounds = array<i64: 4>, scalar_prefetch = 0 : i64, scratch_operands = 0 : i64, tpu.core_type = #tpu.core_type<tc>, window_params = [{transform_indices = @transform_0, window_bounds = array<i64: 8, 8>}, {pipeline_mode = #tpu.pipeline_mode<synchronous>, transform_indices = @transform_1, window_bounds = array<i64: 64, 128>}, {pipeline_mode = #tpu.pipeline_mode<synchronous>, transform_indices = @transform_2, window_bounds = array<i64: 128, 128>}, {pipeline_mode = #tpu.pipeline_mode<synchronous>, transform_indices = @transform_3, window_bounds = array<i64: 1, 128>}, {transform_indices = @transform_4, window_bounds = array<i64: 8, 128>}]} {
    %c0 = arith.constant 0 : index
    %c0_0 = arith.constant 0 : index
    %0 = vector.load %arg1[%c0, %c0_0] : memref<8x8xi32, #tpu.memory_space<vmem>>, vector<8x8xi32>
    %1 = vector.shape_cast %0 : vector<8x8xi32> to vector<8x8x1xi32>
    %2 = tpu.iota {dimensions = array<i32: 2>} : vector<8x8x64xi32>
    %3 = vector.broadcast %1 : vector<8x8x1xi32> to vector<8x8x64xi32>
    %4 = arith.cmpi eq, %3, %2 : vector<8x8x64xi32>
    %5 = arith.extui %4 : vector<8x8x64xi1> to vector<8x8x64xi32>
    %6 = arith.sitofp %5 : vector<8x8x64xi32> to vector<8x8x64xf32>
    %cst = arith.constant dense<0.000000e+00> : vector<8x64xf32>
    %7 = vector.multi_reduction <add>, %6, %cst [1] : vector<8x8x64xf32> to vector<8x64xf32>
    %c0_1 = arith.constant 0 : index
    %c0_2 = arith.constant 0 : index
    %8 = vector.load %arg2[%c0_1, %c0_2] : memref<64x128xf32, #tpu.memory_space<vmem>>, vector<64x128xf32>
    %cst_3 = arith.constant dense<0.000000e+00> : vector<8x128xf32>
    %9 = tpu.matmul %7, %8, %cst_3 {dimension_numbers = #tpu.dot_dimension_numbers<[1], [0], [0], [1], [0, 0, 1, 1], [], []>, precision = #tpu.contract_precision<fp32>} : vector<8x64xf32>, vector<64x128xf32>, vector<8x128xf32> -> vector<8x128xf32>
    %cst_4 = arith.constant 1.250000e-01 : f32
    %10 = vector.broadcast %cst_4 : f32 to vector<8x128xf32>
    %11 = arith.mulf %9, %10 : vector<8x128xf32>
    %c0_5 = arith.constant 0 : index
    %c0_6 = arith.constant 0 : index
    %12 = vector.load %arg3[%c0_5, %c0_6] : memref<128x128xf32, #tpu.memory_space<vmem>>, vector<128x128xf32>
    %cst_7 = arith.constant dense<0.000000e+00> : vector<8x128xf32>
    %13 = tpu.matmul %11, %12, %cst_7 {dimension_numbers = #tpu.dot_dimension_numbers<[1], [0], [0], [1], [0, 0, 1, 1], [], []>, precision = #tpu.contract_precision<fp32>} : vector<8x128xf32>, vector<128x128xf32>, vector<8x128xf32> -> vector<8x128xf32>
    %c0_8 = arith.constant 0 : index
    %c0_9 = arith.constant 0 : index
    %14 = vector.load %arg4[%c0_8, %c0_9] : memref<1x128xf32, #tpu.memory_space<vmem>>, vector<1x128xf32>
    %15 = vector.broadcast %14 : vector<1x128xf32> to vector<8x128xf32>
    %16 = arith.addf %13, %15 : vector<8x128xf32>
    %c0_10 = arith.constant 0 : index
    %c0_11 = arith.constant 0 : index
    %17 = vector.load %arg5[%c0_10, %c0_11] : memref<8x128xf32, #tpu.memory_space<vmem>>, vector<8x128xf32>
    tpu.vector_store %arg5[%c0_10, %c0_11], %16 {strides = array<i32>} : memref<8x128xf32, #tpu.memory_space<vmem>>, vector<8x128xf32>,
    return
  }
  func.func @transform_0(%arg0: i32) -> (i32, i32) {
    %c0_i32 = arith.constant 0 : i32
    %c0_i32_0 = arith.constant 0 : i32
    return %arg0, %c0_i32 : i32, i32
  }
  func.func @transform_1(%arg0: i32) -> (i32, i32) {
    %c0_i32 = arith.constant 0 : i32
    %c0_i32_0 = arith.constant 0 : i32
    %c0_i32_1 = arith.constant 0 : i32
    return %c0_i32, %c0_i32_0 : i32, i32
  }
  func.func @transform_2(%arg0: i32) -> (i32, i32) {
    %c0_i32 = arith.constant 0 : i32
    %c0_i32_0 = arith.constant 0 : i32
    %c0_i32_1 = arith.constant 0 : i32
    return %c0_i32, %c0_i32_0 : i32, i32
  }
  func.func @transform_3(%arg0: i32) -> (i32, i32) {
    %c0_i32 = arith.constant 0 : i32
    %c0_i32_0 = arith.constant 0 : i32
    %c0_i32_1 = arith.constant 0 : i32
    return %c0_i32, %c0_i32_0 : i32, i32
  }
  func.func @transform_4(%arg0: i32) -> (i32, i32) {
    %c0_i32 = arith.constant 0 : i32
    %c0_i32_0 = arith.constant 0 : i32
    return %arg0, %c0_i32 : i32, i32
  }
}

</mosaic_0001>

<bundles_post_ra>
// kernel: key_value_network_forward.1
= control target key start
LH: loop header
LB: loop body
LE: loop exit
PB: predicated region body
PF: predicated region fallthrough
CT: control target
= control target key end

     0   :  { %9 = vsyncpa [#allocation3], 0  ;;  %s2999_s0 = inlined_call_operand.vmem [shape: s32[32,8], index: 0, kind: input, shape index: {}]   ;;  %s3000_s1 = inlined_call_operand.vmem [shape: f32[64,128], index: 1, kind: input, shape index: {}]   ;;  %s3001_s2 = inlined_call_operand.vmem [shape: f32[128,128], index: 2, kind: input, shape index: {}]   ;;  %s3002_s3 = inlined_call_operand.vmem [shape: f32[1,128], index: 3, kind: input, shape index: {}]   ;;  %s3003_s4 = inlined_call_operand.hbm [shape: f32[32,128], index: 4, kind: output, shape index: {}]  }
   0x1   :  { %11 = vsyncpa [#allocation3 + $0x1], 0  ;;  %s2271_s15 = smov 0   ;;  %s2273_s16 = smov 0  }
   0x2   :  { %s2275_s17 = smov 0   ;;  %s2277_s18 = smov 0  }
   0x3 LB: > { %s2292_s19 = sadd.s32 4294967295, %s2241_s18   ;;  %s1641_s20 = sadd.s32 4294967294, %s2241_s18   ;;  %s2241_s18 = sphi %s2277_s18, %s3017_s18   ;;  %s2237_s17 = sphi %s2275_s17, %s3016_s17   ;;  %s2233_s16 = sphi %s2273_s16, %s3015_s16   ;;  %s2229_s15 = sphi %s2271_s15, %s3014_s15  }
   0x4   : > { %s2296_s21 = sadd.s32 1, %s2241_s18   ;;  %s113_s22 = sadd.s32 1, %s2237_s17 }
   0x5   : > { %s110_s23 = ssub.s32 %s2241_s18, %s2296_s21  ;;  %p123_p0 = scmp.ne.s32.totalorder %s2237_s17, %s2233_s16 }
   0x6   : > { %p111_p1 = scmp.eq.s32.totalorder %s110_s23, 0  ;;  %p124_p2 = scmp.eq.s32.totalorder %s2292_s19, 3 }
   0x7   : > { %p129_p3 = scmp.ne.s32.totalorder %s2233_s16, %s2229_s15  ;;  %p130_p4 = scmp.eq.s32.totalorder %s1641_s20, 3 }
   0x8   : > { %s2307_s24 = scalar_select %p111_p1, %s2237_s17, %s113_s22  }
   0x9   : > { %p2309_p5 = por %p124_p2, %p123_p0  ;;  %p2313_p6 = por %p130_p4, %p129_p3 }
   0xa   : > { %p1644_p7 = scmp.ge.s32.totalorder %s2241_s18, 1  ;;  %p164_p8 = scmp.lt.s32.totalorder %s2241_s18, 5 }
   0xc   : > { %p165_p9 = pnand %p1644_p7, %p164_p8 }
   0xd   : > { %p189_p10 = scmp.lt.s32.totalorder (!%p165_p9), %s2292_s19, 3  ;;  %s186_s5 = sand.u32 (!%p165_p9), 1, %s2233_s16  }
   0xe   : > { %168 = sbr.rel (%p165_p9) target bundleno = 702 (0x2be), region = 36  ;;  %s1645_s6 = sshll.u32 (!%p165_p9), %s186_s5, 3 }
   0xf   : > { %s188_s8 = scalar_lea.vmem (!%p165_p9), [#allocation2], %s1645_s6  ;;  %s1569_s13 = scalar_lea.sflag (!%p165_p9), [#allocation3], %s186_s5 }
  0x10   : > { %s1582_s9 = sshll.u32 (!%p165_p9), %s188_s8, 4  ;;  %s2245_s20 = smov (!%p165_p9), [#allocation2]   ;;  %s1583_s9 = int_to_ptr.vmem [resolvable:$true] %s1582_s9 }
  0x11   : > { %s2181_s14 = scalar_lea.vmem (!%p165_p9), %s1583_s9, 128  ;;  %s2185_s22 = sshll.u32 (!%p165_p9), %s2245_s20, 4  ;;  %s2186_s22 = int_to_ptr.vmem [resolvable:$false] %s2185_s22 }
  0x12   : > { %p2182_p11 = scmp.ne.s32.totalorder (!%p165_p9), %s1583_s9, %s2181_s14  ;;  %p2188_p0 = scmp.lt.s32.totalorder (!%p165_p9), %s1583_s9, %s2186_s22 }
  0x13   : > { %v194_v0 = vlaneseq  ;;  %v2243_v1 = vmov 0.0   ;;  %s190_s27 = scalar_select %p189_p10, %s2292_s19, 3  ;;  %v340_v6 = vld [vmem:[%s3000_s1 + $0x38] sm:$0xff]  ;;  %v339_v10 = vld [vmem:[%s3000_s1 + $0x30] sm:$0xff]  ;;  %v338_v16 = vld [vmem:[%s3000_s1 + $0x28] sm:$0xff]  ;;  %vm2244_vm0 = vmmov 0  }
  0x14   : > { %1835 = vmatprep.subr.mxu1 %v2243_v1  ;;  %1816 = vmatprep.subr.mxu0 %v2243_v1  ;;  %v2330_v9 = vand.u32 4294901760, %v340_v6  ;;  %v2342_v19 = vand.u32 4294901760, %v339_v10  ;;  %v2344_v20 = vand.u32 4294901760, %v338_v16  ;;  %v337_v21 = vld [vmem:[%s3000_s1 + $0x20] sm:$0xff]  ;;  %v336_v28 = vld [vmem:[%s3000_s1 + $0x18] sm:$0xff]  ;;  %v335_v36 = vld [vmem:[%s3000_s1 + $0x10] sm:$0xff]  ;;  %p2183_p12 = pnand %p2182_p11, %p2309_p5 }
  0x15   : > { %v195_v2 = vshrl.u32 %v194_v0, 7  ;;  %s1646_s28 = sshll.u32 %s190_s27, 3  ;;  %v2357_v25 = vand.u32 4294901760, %v337_v21  ;;  %v2372_v35 = vand.u32 4294901760, %v336_v28  ;;  %v2381_v39 = vand.u32 4294901760, %v335_v36  ;;  %v334_v44 = vld [vmem:[%s3000_s1 + $0x8] sm:$0xff]  ;;  %1851 = vmatprep.mubr.msk.f32.mxu1 %vm2244_vm0, %v2243_v1  ;;  %1832 = vmatprep.mubr.msk.f32.mxu0 %vm2244_vm0, %v2243_v1 }
  0x16   : > { %s192_s7 = scalar_lea.vmem %s2999_s0, %s1646_s28  ;;  %1817 = vmatpush3.msra.mxu0 %v2330_v9  ;;  %v2340_v18 = vsub.f32 %v340_v6, %v2330_v9  ;;  %v2352_v23 = vsub.f32 %v339_v10, %v2342_v19  ;;  %v2355_v24 = vsub.f32 %v338_v16, %v2344_v20  ;;  %v2398_v48 = vand.u32 4294901760, %v334_v44  ;;  %v333_v51 = vld [vmem:[%s3000_s1] sm:$0xff]  ;;  %p2184_p13 = pneg %p2183_p12 }
  0x17   : > { %v210_v3 = vsub.s32 2, %v195_v2  ;;  %v196_v4 = vsub.s32 0, %v195_v2  ;;  %v217_v5 = vsub.s32 3, %v195_v2  ;;  %v203_v7 = vsub.s32 1, %v195_v2  ;;  %v193_v8 = vld [vmem:[%s192_s7] sm:$0xff]  ;;  %1818 = vmatprep.subr.mxu0 %v2243_v1  ;;  %s1657_s7 = sshll.u32 %s2292_s19, 7 }
  0x18   : > { %v231_v14 = vsub.s32 5, %v195_v2  ;;  %v224_v15 = vsub.s32 4, %v195_v2  ;;  %v467_v22 = vand.u32 4294901760, %v2340_v18  ;;  %1819 = vmatpush3.msra.mxu0 %v2342_v19  ;;  %v245_v26 = vsub.s32 7, %v195_v2  ;;  %s1580_s12 = scalar_lea.hbm %s3003_s4, %s1657_s7  ;;  %s2187_s19 = scalar_lea.vmem %s2186_s22, 256 }
  0x19   : > { %v211_v11 = vrot.slane %v193_v8, %v210_v3  ;;  %v197_v12 = vrot.slane %v193_v8, %v196_v4  ;;  %v218_v13 = vrot.slane %v193_v8, %v217_v5  ;;  %v204_v17 = vrot.slane %v193_v8, %v203_v7  ;;  %1820 = vmatprep.subr.mxu0 %v2243_v1  ;;  %p2189_p1 = scmp.lt.s32.totalorder %s2187_s19, %s2181_s14 }
  0x1a   : > { %v238_v27 = vsub.s32 6, %v195_v2  ;;  %v232_v29 = vrot.slane %v193_v8, %v231_v14  ;;  %v225_v30 = vrot.slane %v193_v8, %v224_v15  ;;  %v468_v31 = vsub.f32 %v2340_v18, %v467_v22  ;;  %1821 = vmatpush3.msra.mxu0 %v2344_v20 }
  0x1b   : > { %213 = vbcast.lane.b32.xlu1 %v211_v11, 256  ;;  %199 = vbcast.lane.b32.xlu0 %v197_v12, 256  ;;  %v474_v32 = vand.u32 4294901760, %v2352_v23  ;;  %v481_v33 = vand.u32 4294901760, %v2355_v24  ;;  %v2370_v34 = vsub.f32 %v337_v21, %v2357_v25  ;;  %v246_v40 = vrot.slane %v193_v8, %v245_v26  ;;  %p2190_p2 = por %p2189_p1, %p2188_p0 }
  0x1c   : > { %v469_v37 = vand.u32 4294901760, %v468_v31  ;;  %1822 = vmatprep.subr.mxu0 %v2243_v1  ;;  %v2389_v43 = vsub.f32 %v336_v28, %v2372_v35  ;;  %v239_v45 = vrot.slane %v193_v8, %v238_v27  ;;  %v2396_v47 = vsub.f32 %v335_v36, %v2381_v39 }
  0x1d   : > { %v475_v38 = vsub.f32 %v2352_v23, %v474_v32  ;;  %v482_v41 = vsub.f32 %v2355_v24, %v481_v33  ;;  %v488_v42 = vand.u32 4294901760, %v2370_v34  ;;  %1823 = vmatpush3.msra.mxu0 %v2357_v25  ;;  %v2411_v54 = vsub.f32 %v334_v44, %v2398_v48  ;;  %p2191_p3 = pnand %p2190_p2, %p2184_p13 }
  0x1e   : > { %1836 = vmatpush3.msra.mxu1 %v469_v37  ;;  %v495_v50 = vand.u32 4294901760, %v2389_v43  ;;  %1824 = vmatprep.subr.mxu0 %v2243_v1  ;;  %v502_v53 = vand.u32 4294901760, %v2396_v47  ;;  %v2413_v55 = vand.u32 4294901760, %v333_v51  ;;  %v251_v6 = vand.u32 127, %v194_v0 }
  0x1f   : > { %220 = vbcast.lane.b32.xlu1 %v218_v13, 256  ;;  %206 = vbcast.lane.b32.xlu0 %v204_v17, 256  ;;  %v476_v46 = vand.u32 4294901760, %v475_v38  ;;  %v489_v49 = vsub.f32 %v2370_v34, %v488_v42  ;;  %v483_v52 = vand.u32 4294901760, %v482_v41  ;;  %v509_v59 = vand.u32 4294901760, %v2411_v54 }
  0x20   : > { %1837 = vmatprep.subr.mxu1 %v2243_v1  ;;  %1825 = vmatpush3.msra.mxu0 %v2372_v35  ;;  %v496_v56 = vsub.f32 %v2389_v43, %v495_v50  ;;  %v503_v58 = vsub.f32 %v2396_v47, %v502_v53  ;;  %v2425_v60 = vsub.f32 %v333_v51, %v2413_v55  ;;  %vm276_vm1 = vcmask 523264  }
  0x21   : > { %1838 = vmatpush3.msra.mxu1 %v476_v46  ;;  %1826 = vmatprep.subr.mxu0 %v2243_v1  ;;  %v490_v57 = vand.u32 4294901760, %v489_v49  ;;  %v510_v62 = vsub.f32 %v2411_v54, %v509_v59  ;;  %vm349_vm8 = vcmask 1041409   ;;  %vm351_vm11 = vcmask 1042434  }
  0x22   : > { %1839 = vmatprep.subr.mxu1 %v2243_v1  ;;  %1827 = vmatpush3.msra.mxu0 %v2381_v39  ;;  %v497_v61 = vand.u32 4294901760, %v496_v56  ;;  %v516_v63 = vand.u32 4294901760, %v2425_v60  ;;  %v504_v2 = vand.u32 4294901760, %v503_v58  ;;  %vm353_vm12 = vcmask 1043459  }
  0x23   : > { %234 = vbcast.lane.b32.xlu1 %v232_v29, 256  ;;  %227 = vbcast.lane.b32.xlu0 %v225_v30, 256  ;;  %v511_v4 = vand.u32 4294901760, %v510_v62  ;;  %vm355_vm13 = vcmask 1044484   ;;  %vm357_vm14 = vcmask 1045509   ;;  %vm359_vm15 = vcmask 1046534  }
  0x24   : > { %1840 = vmatpush3.msra.mxu1 %v483_v52  ;;  %1828 = vmatprep.subr.mxu0 %v2243_v1  ;;  %v517_v3 = vsub.f32 %v2425_v60, %v516_v63 }
  0x25   : > { %1841 = vmatprep.subr.mxu1 %v2243_v1  ;;  %1829 = vmatpush3.msra.mxu0 %v2398_v48 }
  0x26   : > { %1842 = vmatpush3.msra.mxu1 %v490_v57  ;;  %1830 = vmatprep.subr.mxu0 %v2243_v1  ;;  %v518_v5 = vand.u32 4294901760, %v517_v3 }
  0x27   : > { %248 = vbcast.lane.b32.xlu1 %v246_v40, 256  ;;  %241 = vbcast.lane.b32.xlu0 %v239_v45, 256 }
  0x28   : > { %1843 = vmatprep.subr.mxu1 %v2243_v1  ;;  %1831 = vmatpush3.msra.mxu0 %v2413_v55 }
  0x29   : > { %1844 = vmatpush3.msra.mxu1 %v497_v61  ;;  %1854 = vmatprep.subr.mxu0 %v2243_v1 }
  0x2a   : > { %1845 = vmatprep.subr.mxu1 %v2243_v1 }
  0x2b   : > { %1846 = vmatpush3.msra.mxu1 %v504_v2 }
  0x2c   : > { %1847 = vmatprep.subr.mxu1 %v2243_v1 }
  0x2d   : > { %1848 = vmatpush3.msra.mxu1 %v511_v4 }
  0x2e   : > { %1849 = vmatprep.subr.mxu1 %v2243_v1 }
  0x2f   : > { %1850 = vmatpush3.msra.mxu1 %v518_v5 }
  0x30   : > { %1873 = vmatprep.subr.mxu1 %v2243_v1 }
  0x8d   : > { %v214_v7 = vpop.permute.xlu1 %213  ;;  %v200_v8 = vpop.permute.xlu0 %199 }
  0x8e   : > { %vm254_vm2 = vcmp.eq.s32.totalorder %v214_v7, %v251_v6  ;;  %vm252_vm3 = vcmp.eq.s32.totalorder %v200_v8, %v251_v6 }
  0x8f   : > { %v1649_v10 = vsel %vm254_vm2, 1.0, %v2243_v1  ;;  %v1647_v11 = vsel %vm252_vm3, 1.0, %v2243_v1  ;;  %vm361_vm2 = vcmask 1047559  }
  0x90   : > { %v291_v12 = vsel %vm276_vm1, %v1649_v10, 0.0  ;;  %v277_v13 = vsel %vm276_vm1, %v1647_v11, 0.0 }
  0x91   : > { %v292_v14 = vrot.slane %v291_v12, 4  ;;  %v278_v15 = vrot.slane %v277_v13, 4  ;;  %v221_v16 = vpop.permute.xlu1 %220  ;;  %v207_v17 = vpop.permute.xlu0 %206 }
  0x92   : > { %vm255_vm4 = vcmp.eq.s32.totalorder %v221_v16, %v251_v6  ;;  %vm253_vm5 = vcmp.eq.s32.totalorder %v207_v17, %v251_v6 }
  0x93   : > { %v293_v0 = vadd.f32 %v292_v14, %v291_v12  ;;  %v279_v21 = vadd.f32 %v278_v15, %v277_v13  ;;  %v1650_v26 = vsel %vm255_vm4, 1.0, %v2243_v1  ;;  %v1648_v27 = vsel %vm253_vm5, 1.0, %v2243_v1 }
  0x94   : > { %v298_v28 = vsel %vm276_vm1, %v1650_v26, 0.0  ;;  %v284_v29 = vsel %vm276_vm1, %v1648_v27, 0.0 }
  0x95   : > { %v294_v30 = vrot.slane %v293_v0, 2  ;;  %v280_v31 = vrot.slane %v279_v21, 2  ;;  %v299_v36 = vrot.slane %v298_v28, 4  ;;  %v285_v37 = vrot.slane %v284_v29, 4  ;;  %v235_v38 = vpop.permute.xlu1 %234  ;;  %v228_v40 = vpop.permute.xlu0 %227 }
  0x96   : > { %vm257_vm6 = vcmp.eq.s32.totalorder %v235_v38, %v251_v6  ;;  %vm256_vm7 = vcmp.eq.s32.totalorder %v228_v40, %v251_v6 }
  0x97   : > { %v295_v41 = vadd.f32 %v294_v30, %v293_v0  ;;  %v281_v44 = vadd.f32 %v280_v31, %v279_v21  ;;  %v300_v45 = vadd.f32 %v299_v36, %v298_v28  ;;  %v286_v46 = vadd.f32 %v285_v37, %v284_v29 }
  0x98   : > { %v1652_v49 = vsel %vm257_vm6, 1.0, %v2243_v1  ;;  %v1651_v51 = vsel %vm256_vm7, 1.0, %v2243_v1 }
  0x99   : > { %v301_v52 = vrot.slane %v300_v45, 2  ;;  %v287_v56 = vrot.slane %v286_v46, 2  ;;  %v249_v57 = vpop.permute.xlu1 %248  ;;  %v242_v58 = vpop.permute.xlu0 %241  ;;  %v312_v61 = vsel %vm276_vm1, %v1652_v49, 0.0  ;;  %v305_v62 = vsel %vm276_vm1, %v1651_v51, 0.0 }
  0x9a   : > { %vm259_vm9 = vcmp.eq.s32.totalorder %v249_v57, %v251_v6  ;;  %vm258_vm10 = vcmp.eq.s32.totalorder %v242_v58, %v251_v6  ;;  %v296_v2 = vrot.slane %v295_v41, 1  ;;  %v282_v3 = vrot.slane %v281_v44, 1 }
  0x9b   : > { %v302_v4 = vadd.f32 %v301_v52, %v300_v45  ;;  %v288_v5 = vadd.f32 %v287_v56, %v286_v46  ;;  %v313_v7 = vrot.slane %v312_v61, 4  ;;  %v306_v8 = vrot.slane %v305_v62, 4 }
  0x9c   : > { %v1654_v10 = vsel %vm259_vm9, 1.0, %v2243_v1  ;;  %v1653_v11 = vsel %vm258_vm10, 1.0, %v2243_v1  ;;  %v297_v0 = vadd.f32 %v296_v2, %v295_v41  ;;  %v283_v21 = vadd.f32 %v282_v3, %v281_v44 }
  0x9d   : > { %v289_v12 = vrot.slane %v288_v5, 1  ;;  %v326_v13 = vsel %vm276_vm1, %v1654_v10, 0.0  ;;  %v319_v14 = vsel %vm276_vm1, %v1653_v11, 0.0  ;;  %v314_v15 = vadd.f32 %v313_v7, %v312_v61 }
  0x9e   : > { %v307_v16 = vadd.f32 %v306_v8, %v305_v62  ;;  %v327_v17 = vrot.slane %v326_v13, 4  ;;  %v320_v6 = vrot.slane %v319_v14, 4  ;;  %v303_v26 = vrot.slane %v302_v4, 1 }
  0x9f   : > { %v290_v27 = vadd.f32 %v289_v12, %v288_v5  ;;  %v315_v28 = vrot.slane %v314_v15, 2 }
  0xa0   : > { %v308_v29 = vrot.slane %v307_v16, 2  ;;  %v328_v30 = vadd.f32 %v327_v17, %v326_v13  ;;  %v321_v31 = vadd.f32 %v320_v6, %v319_v14  ;;  %v304_v46 = vadd.f32 %v303_v26, %v302_v4  ;;  %v912_v6 = vld [vmem:[%s3001_s2 + $0x48] sm:$0xff] }
  0xa1   : > { %v350_v36 = vsel %vm349_vm8, %v290_v27, %v283_v21  ;;  %v316_v38 = vadd.f32 %v315_v28, %v314_v15  ;;  %v2638_v27 = vand.u32 4294901760, %v912_v6 }
  0xa2   : > { %v352_v37 = vsel %vm351_vm11, %v297_v0, %v350_v36  ;;  %v309_v40 = vadd.f32 %v308_v29, %v307_v16  ;;  %v329_v45 = vrot.slane %v328_v30, 2  ;;  %v322_v49 = vrot.slane %v321_v31, 2  ;;  %v911_v29 = vld [vmem:[%s3001_s2 + $0x40] sm:$0xff] }
  0xa3   : > { %v317_v51 = vrot.slane %v316_v38, 1  ;;  %v354_v44 = vsel %vm353_vm12, %v304_v46, %v352_v37  ;;  %v2649_v36 = vsub.f32 %v912_v6, %v2638_v27  ;;  %v2651_v37 = vand.u32 4294901760, %v911_v29  ;;  %v904_v6 = vld [vmem:[%s3001_s2 + $0x8] sm:$0xff] }
  0xa4   : > { %v310_v52 = vrot.slane %v309_v40, 1  ;;  %v330_v41 = vadd.f32 %v329_v45, %v328_v30  ;;  %v323_v56 = vadd.f32 %v322_v49, %v321_v31 }
  0xa5   : > { %v318_v57 = vadd.f32 %v317_v51, %v316_v38  ;;  %v1062_v46 = vand.u32 4294901760, %v2649_v36  ;;  %v2667_v49 = vsub.f32 %v911_v29, %v2651_v37 }
  0xa6   : > { %v311_v58 = vadd.f32 %v310_v52, %v309_v40  ;;  %v331_v61 = vrot.slane %v330_v41, 1  ;;  %v324_v62 = vrot.slane %v323_v56, 1  ;;  %v910_v40 = vld [vmem:[%s3001_s2 + $0x38] sm:$0xff] }
  0xa7   : > { %v2669_v51 = vand.u32 4294901760, %v910_v40 }
  0xa8   : > { %v356_v2 = vsel %vm355_vm13, %v311_v58, %v354_v44  ;;  %v332_v3 = vadd.f32 %v331_v61, %v330_v41  ;;  %v325_v5 = vadd.f32 %v324_v62, %v323_v56  ;;  %v909_v41 = vld [vmem:[%s3001_s2 + $0x30] sm:$0xff]  ;;  %v1063_v56 = vsub.f32 %v2649_v36, %v1062_v46  ;;  %v908_v62 = vld [vmem:[%s3001_s2 + $0x28] sm:$0xff] }
  0xa9   : > { %v358_v7 = vsel %vm357_vm14, %v318_v57, %v356_v2  ;;  %v1069_v57 = vand.u32 4294901760, %v2667_v49  ;;  %v2682_v58 = vsub.f32 %v910_v40, %v2669_v51  ;;  %v2685_v61 = vand.u32 4294901760, %v909_v41  ;;  %v903_v40 = vld [vmem:[%s3001_s2] sm:$0xff] }
  0xaa   : > { %v360_v8 = vsel %vm359_vm15, %v325_v5, %v358_v7  ;;  %v1064_v2 = vand.u32 4294901760, %v1063_v56  ;;  %v2696_v7 = vand.u32 4294901760, %v908_v62 }
  0xab   : > { %v362_v4 = vsel %vm361_vm2, %v332_v3, %v360_v8  ;;  %v1070_v3 = vsub.f32 %v2667_v49, %v1069_v57  ;;  %v1076_v5 = vand.u32 4294901760, %v2682_v58  ;;  %v2700_v8 = vsub.f32 %v909_v41, %v2685_v61 }
  0xac   : > { %v363_v10 = vsel %vm276_vm1, %v362_v4, 0  ;;  %v907_v4 = vld [vmem:[%s3001_s2 + $0x20] sm:$0xff] }
  0xad   : > { %v2471_v11 = vand.u32 4294901760, %v363_v10 }
  0xaf   : > { %1852 = vmatmul.mubr.f32.vlgmr.msra.gmra.mxu1 %v2471_v11  ;;  %v439_v12 = vsub.f32 %v363_v10, %v2471_v11  ;;  %v1071_v10 = vand.u32 4294901760, %v1070_v3 }
  0xb0   : > { %1874 = vmatpush3.msra.mxu1 %v2330_v9  ;;  %1889 = vmatprep.mubr.msk.f32.mxu1 %vm2244_vm0, %v2243_v1 }
  0xb1   : > { %1875 = vmatprep.subr.mxu1 %v2243_v1  ;;  %v440_v13 = vand.u32 4294901760, %v439_v12 }
  0xb2   : > { %1876 = vmatpush3.msra.mxu1 %v2342_v19 }
  0xb3   : > { %1877 = vmatprep.subr.mxu1 %v2243_v1  ;;  %v441_v14 = vsub.f32 %v439_v12, %v440_v13 }
  0xb4   : > { %1878 = vmatpush3.msra.mxu1 %v2344_v20 }
  0xb5   : > { %1879 = vmatprep.subr.mxu1 %v2243_v1  ;;  %v442_v15 = vand.u32 4294901760, %v441_v14  ;;  %v1083_v14 = vand.u32 4294901760, %v2700_v8 }
  0xb6   : > { %1880 = vmatpush3.msra.mxu1 %v2357_v25 }
  0xb7   : > { %1881 = vmatprep.subr.mxu1 %v2243_v1  ;;  %1833 = vmatmul.mubr.f32.vlgmr.msra.gmra.mxu0 %v442_v15  ;;  %v906_v15 = vld [vmem:[%s3001_s2 + $0x18] sm:$0xff] }
  0xb8   : > { %1855 = vmatpush3.msra.mxu0 %v2340_v18  ;;  %1882 = vmatpush3.msra.mxu1 %v2372_v35 }
  0xb9   : > { %1856 = vmatprep.subr.mxu0 %v2243_v1  ;;  %1883 = vmatprep.subr.mxu1 %v2243_v1 }
  0xba   : > { %1857 = vmatpush3.msra.mxu0 %v2352_v23  ;;  %1884 = vmatpush3.msra.mxu1 %v2381_v39  ;;  %v916_v23 = vld [vmem:[%s3001_s2 + $0x68] sm:$0xff] }
  0xbb   : > { %1858 = vmatprep.subr.mxu0 %v2243_v1  ;;  %1885 = vmatprep.subr.mxu1 %v2243_v1 }
  0xbc   : > { %1859 = vmatpush3.msra.mxu0 %v2355_v24  ;;  %1886 = vmatpush3.msra.mxu1 %v2398_v48 }
  0xbd   : > { %1860 = vmatprep.subr.mxu0 %v2243_v1  ;;  %1887 = vmatprep.subr.mxu1 %v2243_v1 }
  0xbe   : > { %1861 = vmatpush3.msra.mxu0 %v2370_v34  ;;  %1888 = vmatpush3.msra.mxu1 %v2413_v55 }
  0xbf   : > { %1862 = vmatprep.subr.mxu0 %v2243_v1  ;;  %1890 = vmatmul.mubr.f32.vlgmr.msra.gmra.mxu1 %v440_v13  ;;  %v2713_v13 = vand.u32 4294901760, %v907_v4 }
  0xc0   : > { %1911 = vmatprep.subr.mxu1 %v2243_v1  ;;  %1863 = vmatpush3.msra.mxu0 %v2389_v43  ;;  %v914_v43 = vld [vmem:[%s3001_s2 + $0x58] sm:$0xff] }
  0xc1   : > { %1912 = vmatpush3.msra.mxu1 %v2330_v9  ;;  %1864 = vmatprep.subr.mxu0 %v2243_v1  ;;  %v918_v9 = vld [vmem:[%s3001_s2 + $0x78] sm:$0xff] }
  0xc2   : > { %1913 = vmatprep.subr.mxu1 %v2243_v1  ;;  %1865 = vmatpush3.msra.mxu0 %v2396_v47  ;;  %v2564_v18 = vand.u32 4294901760, %v918_v9 }
  0xc3   : > { %1914 = vmatpush3.msra.mxu1 %v2342_v19  ;;  %1866 = vmatprep.subr.mxu0 %v2243_v1  ;;  %v917_v19 = vld [vmem:[%s3001_s2 + $0x70] sm:$0xff] }
  0xc4   : > { %1915 = vmatprep.subr.mxu1 %v2243_v1  ;;  %1867 = vmatpush3.msra.mxu0 %v2411_v54  ;;  %v2612_v54 = vand.u32 4294901760, %v914_v43 }
  0xc5   : > { %1916 = vmatpush3.msra.mxu1 %v2344_v20  ;;  %1868 = vmatprep.subr.mxu0 %v2243_v1  ;;  %v2570_v20 = vsub.f32 %v918_v9, %v2564_v18 }
  0xc6   : > { %1917 = vmatprep.subr.mxu1 %v2243_v1  ;;  %1869 = vmatpush3.msra.mxu0 %v2425_v60  ;;  %v2626_v17 = vsub.f32 %v914_v43, %v2612_v54  ;;  %v905_v43 = vld [vmem:[%s3001_s2 + $0x10] sm:$0xff] }
  0xc7   : > { %1870 = vmatprep.mubr.msk.f32.mxu0 %vm2244_vm0, %v2243_v1  ;;  %1918 = vmatpush3.msra.mxu1 %v2357_v25  ;;  %v1020_v24 = vand.u32 4294901760, %v2570_v20 }
  0xc8   : > { %1871 = vmatmul.mubr.f32.vlgmr.msra.gmra.mxu0 %v439_v12  ;;  %1892 = vmatprep.subr.mxu0 %v2243_v1  ;;  %v1048_v28 = vand.u32 4294901760, %v2626_v17  ;;  %v2711_v12 = vsub.f32 %v908_v62, %v2696_v7 }
  0xc9   : > { %1919 = vmatprep.subr.mxu1 %v2243_v1  ;;  %1893 = vmatpush3.msra.mxu0 %v467_v22  ;;  %v2572_v22 = vand.u32 4294901760, %v917_v19  ;;  %v1021_v34 = vsub.f32 %v2570_v20, %v1020_v24 }
  0xca   : > { %1920 = vmatpush3.msra.mxu1 %v2372_v35  ;;  %1894 = vmatprep.subr.mxu0 %v2243_v1  ;;  %v1049_v38 = vsub.f32 %v2626_v17, %v1048_v28 }
  0xcb   : > { %1921 = vmatprep.subr.mxu1 %v2243_v1  ;;  %1895 = vmatpush3.msra.mxu0 %v474_v32  ;;  %v2581_v25 = vsub.f32 %v917_v19, %v2572_v22  ;;  %v2583_v32 = vand.u32 4294901760, %v916_v23  ;;  %v1022_v47 = vand.u32 4294901760, %v1021_v34  ;;  %v1090_v19 = vand.u32 4294901760, %v2711_v12 }
  0xcc   : > { %1922 = vmatpush3.msra.mxu1 %v2381_v39  ;;  %1896 = vmatprep.subr.mxu0 %v2243_v1  ;;  %v1050_v52 = vand.u32 4294901760, %v1049_v38  ;;  %v1084_v34 = vsub.f32 %v2700_v8, %v1083_v14  ;;  %v2760_v38 = vand.u32 4294901760, %v904_v6 }
  0xcd   : > { %1923 = vmatprep.subr.mxu1 %v2243_v1  ;;  %1897 = vmatpush3.msra.mxu0 %v481_v33  ;;  %v915_v33 = vld [vmem:[%s3001_s2 + $0x60] sm:$0xff]  ;;  %v1027_v35 = vand.u32 4294901760, %v2581_v25  ;;  %v2595_v39 = vsub.f32 %v916_v23, %v2583_v32  ;;  %v2724_v23 = vsub.f32 %v907_v4, %v2713_v13 }
  0xce   : > { %1924 = vmatpush3.msra.mxu1 %v2398_v48  ;;  %1898 = vmatprep.subr.mxu0 %v2243_v1  ;;  %v2775_v56 = vsub.f32 %v904_v6, %v2760_v38 }
  0xcf   : > { %1925 = vmatprep.subr.mxu1 %v2243_v1  ;;  %1899 = vmatpush3.msra.mxu0 %v488_v42  ;;  %v2597_v42 = vand.u32 4294901760, %v915_v33  ;;  %v1028_v48 = vsub.f32 %v2581_v25, %v1027_v35 }
  0xd0   : > { %1926 = vmatpush3.msra.mxu1 %v2413_v55  ;;  %1927 = vmatprep.mubr.msk.f32.mxu1 %vm2244_vm0, %v2243_v1  ;;  %v913_v55 = vld [vmem:[%s3001_s2 + $0x50] sm:$0xff]  ;;  %v3005_v4 = vand.u32 4294901760, %v2775_v56 }
  0xd1   : > { %1900 = vmatprep.subr.mxu0 %v2243_v1  ;;  %1928 = vmatmul.mubr.f32.vlgmr.msra.gmra.mxu1 %v2471_v11  ;;  %v2622_v16 = vand.u32 4294901760, %v913_v55 }
  0xd2   : > { %1901 = vmatpush3.msra.mxu0 %v495_v50  ;;  %1908 = vmatprep.mubr.msk.f32.mxu0 %vm2244_vm0, %v2243_v1  ;;  %v1034_v50 = vand.u32 4294901760, %v2595_v39 }
  0xd3   : > { %1902 = vmatprep.subr.mxu0 %v2243_v1  ;;  %1965 = vmatprep.subr.mxu1 %v2243_v1  ;;  %v2636_v26 = vsub.f32 %v913_v55, %v2622_v16 }
  0xd4   : > { %1903 = vmatpush3.msra.mxu0 %v502_v53  ;;  %1997 = vmatprep.mubr.msk.f32.mxu1 %vm2244_vm0, %v2243_v1  ;;  %v2609_v53 = vsub.f32 %v915_v33, %v2597_v42  ;;  %v1035_v60 = vsub.f32 %v2595_v39, %v1034_v50  ;;  %v2726_v33 = vand.u32 4294901760, %v906_v15 }
  0xd5   : > { %1904 = vmatprep.subr.mxu0 %v2243_v1  ;;  %1966 = vmatpush3.msra.mxu1 %v1022_v47  ;;  %v1055_v31 = vand.u32 4294901760, %v2636_v26  ;;  %v1091_v47 = vsub.f32 %v2711_v12, %v1090_v19 }
  0xd6   : > { %1905 = vmatpush3.msra.mxu0 %v509_v59  ;;  %v1029_v59 = vand.u32 4294901760, %v1028_v48  ;;  %1967 = vmatprep.subr.mxu1 %v2243_v1  ;;  %v1036_v0 = vand.u32 4294901760, %v1035_v60  ;;  %v1097_v48 = vand.u32 4294901760, %v2724_v23  ;;  %v2742_v55 = vsub.f32 %v906_v15, %v2726_v33 }
  0xd7   : > { %1906 = vmatprep.subr.mxu0 %v2243_v1  ;;  %v1056_v45 = vsub.f32 %v2636_v26, %v1055_v31  ;;  %v1085_v60 = vand.u32 4294901760, %v1084_v34  ;;  %v1119_v15 = vsub.f32 %v2775_v56, %v3005_v4 }
  0xd8   : > { %1907 = vmatpush3.msra.mxu0 %v516_v63  ;;  %v1041_v63 = vand.u32 4294901760, %v2609_v53  ;;  %1968 = vmatpush3.msra.mxu1 %v1029_v59  ;;  %v2744_v59 = vand.u32 4294901760, %v905_v43  ;;  %v3007_v29 = vand.u32 4294901760, %v2742_v55 }
  0xd9   : > { %1909 = vmatmul.mubr.f32.vlgmr.msra.gmra.mxu0 %v2471_v11  ;;  %1930 = vmatprep.subr.mxu0 %v2243_v1  ;;  %v1057_v44 = vand.u32 4294901760, %v1056_v45  ;;  %v1077_v11 = vsub.f32 %v2682_v58, %v1076_v5  ;;  %v1120_v34 = vand.u32 4294901760, %v1119_v15 }
  0xda   : > { %1962 = vmatprep.mubr.msk.f32.mxu0 %vm2244_vm0, %v2243_v1  ;;  %1931 = vmatpush3.msra.mxu0 %v2564_v18  ;;  %v1042_v21 = vsub.f32 %v2609_v53, %v1041_v63 }
  0xdb   : > { %1932 = vmatprep.subr.mxu0 %v2243_v1  ;;  %1969 = vmatprep.subr.mxu1 %v2243_v1  ;;  %v1078_v9 = vand.u32 4294901760, %v1077_v11 }
  0xdc   : > { %1933 = vmatpush3.msra.mxu0 %v2572_v22  ;;  %1970 = vmatpush3.msra.mxu1 %v1036_v0  ;;  %v1043_v30 = vand.u32 4294901760, %v1042_v21  ;;  %v1092_v0 = vand.u32 4294901760, %v1091_v47  ;;  %v1098_v21 = vsub.f32 %v2724_v23, %v1097_v48 }
  0xdd   : > { %1934 = vmatprep.subr.mxu0 %v2243_v1  ;;  %1971 = vmatprep.subr.mxu1 %v2243_v1 }
  0xde   : > { %1935 = vmatpush3.msra.mxu0 %v2583_v32  ;;  %1972 = vmatpush3.msra.mxu1 %v1043_v30  ;;  %v2757_v30 = vsub.f32 %v905_v43, %v2744_v59  ;;  %v1099_v45 = vand.u32 4294901760, %v1098_v21 }
  0xdf   : > { %1936 = vmatprep.subr.mxu0 %v2243_v1  ;;  %1973 = vmatprep.subr.mxu1 %v2243_v1 }
  0xe0   : > { %1937 = vmatpush3.msra.mxu0 %v2597_v42  ;;  %1974 = vmatpush3.msra.mxu1 %v1050_v52  ;;  %v1105_v52 = vsub.f32 %v2742_v55, %v3007_v29  ;;  %v3006_v41 = vand.u32 4294901760, %v2757_v30 }
  0xe1   : > { %1938 = vmatprep.subr.mxu0 %v2243_v1  ;;  %1975 = vmatprep.subr.mxu1 %v2243_v1 }
  0xe2   : > { %1939 = vmatpush3.msra.mxu0 %v2612_v54  ;;  %1976 = vmatpush3.msra.mxu1 %v1057_v44  ;;  %v2771_v44 = vand.u32 4294901760, %v903_v40  ;;  %v1106_v62 = vand.u32 4294901760, %v1105_v52 }
  0xe3   : > { %1940 = vmatprep.subr.mxu0 %v2243_v1  ;;  %1977 = vmatprep.subr.mxu1 %v2243_v1 }
  0xe4   : > { %1941 = vmatpush3.msra.mxu0 %v2622_v16  ;;  %1978 = vmatpush3.msra.mxu1 %v1064_v2  ;;  %v1112_v2 = vsub.f32 %v2757_v30, %v3006_v41  ;;  %v2783_v3 = vsub.f32 %v903_v40, %v2771_v44 }
  0xe5   : > { %1942 = vmatprep.subr.mxu0 %v2243_v1  ;;  %1979 = vmatprep.subr.mxu1 %v2243_v1 }
  0xe6   : > { %1943 = vmatpush3.msra.mxu0 %v2638_v27  ;;  %1980 = vmatpush3.msra.mxu1 %v1071_v10  ;;  %v1113_v10 = vand.u32 4294901760, %v1112_v2  ;;  %v3004_v11 = vand.u32 4294901760, %v2783_v3 }
  0xe7   : > { %1944 = vmatprep.subr.mxu0 %v2243_v1  ;;  %1981 = vmatprep.subr.mxu1 %v2243_v1 }
  0xe8   : > { %1945 = vmatpush3.msra.mxu0 %v2651_v37  ;;  %1982 = vmatpush3.msra.mxu1 %v1078_v9  ;;  %v1126_v9 = vsub.f32 %v2783_v3, %v3004_v11 }
  0xe9   : > { %1946 = vmatprep.subr.mxu0 %v2243_v1  ;;  %1983 = vmatprep.subr.mxu1 %v2243_v1 }
  0xea   : > { %1947 = vmatpush3.msra.mxu0 %v2669_v51  ;;  %1984 = vmatpush3.msra.mxu1 %v1085_v60  ;;  %v1127_v43 = vand.u32 4294901760, %v1126_v9 }
  0xeb   : > { %1948 = vmatprep.subr.mxu0 %v2243_v1  ;;  %1985 = vmatprep.subr.mxu1 %v2243_v1 }
  0xec   : > { %1949 = vmatpush3.msra.mxu0 %v2685_v61  ;;  %1986 = vmatpush3.msra.mxu1 %v1092_v0 }
  0xed   : > { %1950 = vmatprep.subr.mxu0 %v2243_v1  ;;  %1987 = vmatprep.subr.mxu1 %v2243_v1 }
  0xee   : > { %1951 = vmatpush3.msra.mxu0 %v2696_v7  ;;  %1988 = vmatpush3.msra.mxu1 %v1099_v45 }
  0xef   : > { %1952 = vmatprep.subr.mxu0 %v2243_v1  ;;  %1989 = vmatprep.subr.mxu1 %v2243_v1 }
  0xf0   : > { %1953 = vmatpush3.msra.mxu0 %v2713_v13  ;;  %1990 = vmatpush3.msra.mxu1 %v1106_v62 }
  0xf1   : > { %1954 = vmatprep.subr.mxu0 %v2243_v1  ;;  %1991 = vmatprep.subr.mxu1 %v2243_v1 }
  0xf2   : > { %1955 = vmatpush3.msra.mxu0 %v2726_v33  ;;  %1992 = vmatpush3.msra.mxu1 %v1113_v10 }
  0xf3   : > { %1956 = vmatprep.subr.mxu0 %v2243_v1  ;;  %1993 = vmatprep.subr.mxu1 %v2243_v1 }
  0xf4   : > { %1957 = vmatpush3.msra.mxu0 %v2744_v59  ;;  %1994 = vmatpush3.msra.mxu1 %v1120_v34 }
  0xf5   : > { %1958 = vmatprep.subr.mxu0 %v2243_v1  ;;  %1995 = vmatprep.subr.mxu1 %v2243_v1 }
  0xf6   : > { %1959 = vmatpush3.msra.mxu0 %v2760_v38  ;;  %1996 = vmatpush3.msra.mxu1 %v1127_v43 }
  0xf7   : > { %1960 = vmatprep.subr.mxu0 %v2243_v1  ;;  %2035 = vmatprep.subr.mxu1 %v2243_v1 }
  0xf8   : > { %1961 = vmatpush3.msra.mxu0 %v2771_v44 }
  0xf9   : > { %2000 = vmatprep.subr.mxu0 %v2243_v1 }
 0x16f   : > { %v555_v47 = vpop.f32.mrf.mxu1 }
 0x171   : > { %v1853_v60 = vpop.f32.mrf.mxu1 }
 0x177   : > { %v444_v6 = vpop.f32.mrf.mxu0 }
 0x178   : > { %v556_v2 = vadd.f32 %v555_v47, %v444_v6 }
 0x179   : > { %v1834_v0 = vpop.f32.mrf.mxu0 }
 0x17f   : > { %v724_v21 = vpop.f32.mrf.mxu1 }
 0x181   : > { %v1891_v40 = vpop.f32.mrf.mxu1 }
 0x188   : > { %v643_v45 = vpop.f32.mrf.mxu0 }
 0x189   : > { %v644_v15 = vadd.f32 %v643_v45, %v556_v2 }
 0x18a   : > { %v1872_v52 = vpop.f32.mrf.mxu0 }
 0x18b   : > { %v725_v11 = vadd.f32 %v724_v21, %v644_v15 }
 0x191   : > { %v898_v62 = vpop.f32.mrf.mxu1 }
 0x193   : > { %v1929_v10 = vpop.f32.mrf.mxu1 }
 0x199   : > { %v819_v9 = vpop.f32.mrf.mxu0 }
 0x19a   : > { %v820_v34 = vadd.f32 %v819_v9, %v725_v11 }
 0x19b   : > { %v1910_v4 = vpop.f32.mrf.mxu0 }
 0x19c   : > { %v899_v41 = vadd.f32 %v898_v62, %v820_v34 }
 0x19e   : > { %v902_v43 = vmul.f32 0.125, %v899_v41 }
 0x1a0   : > { %v2801_v29 = vand.u32 4294901760, %v902_v43 }
 0x1a2   : > { %v2804_v60 = vsub.f32 %v902_v43, %v2801_v29  ;;  %1998 = vmatmul.mubr.f32.vlgmr.msra.gmra.mxu1 %v2801_v29 }
 0x1a3   : > { %2036 = vmatpush3.msra.mxu1 %v2564_v18  ;;  %2067 = vmatprep.mubr.msk.f32.mxu1 %vm2244_vm0, %v2243_v1 }
 0x1a4   : > { %v1009_v47 = vand.u32 4294901760, %v2804_v60  ;;  %2037 = vmatprep.subr.mxu1 %v2243_v1 }
 0x1a5   : > { %2038 = vmatpush3.msra.mxu1 %v2572_v22 }
 0x1a6   : > { %2039 = vmatprep.subr.mxu1 %v2243_v1  ;;  %v1010_v41 = vsub.f32 %v2804_v60, %v1009_v47 }
 0x1a7   : > { %2040 = vmatpush3.msra.mxu1 %v2583_v32 }
 0x1a8   : > { %2041 = vmatprep.subr.mxu1 %v2243_v1  ;;  %v1011_v4 = vand.u32 4294901760, %v1010_v41 }
 0x1a9   : > { %2042 = vmatpush3.msra.mxu1 %v2597_v42 }
 0x1aa   : > { %2043 = vmatprep.subr.mxu1 %v2243_v1  ;;  %1963 = vmatmul.mubr.f32.vlgmr.msra.gmra.mxu0 %v1011_v4 }
 0x1ab   : > { %2001 = vmatpush3.msra.mxu0 %v2570_v20  ;;  %2044 = vmatpush3.msra.mxu1 %v2612_v54  ;;  %v3011_v20 = vand.u32 4294901760, %v2757_v30 }
 0x1ac   : > { %2002 = vmatprep.subr.mxu0 %v2243_v1  ;;  %2045 = vmatprep.subr.mxu1 %v2243_v1 }
 0x1ad   : > { %2003 = vmatpush3.msra.mxu0 %v2581_v25  ;;  %2046 = vmatpush3.msra.mxu1 %v2622_v16 }
 0x1ae   : > { %2004 = vmatprep.subr.mxu0 %v2243_v1  ;;  %2047 = vmatprep.subr.mxu1 %v2243_v1 }
 0x1af   : > { %2005 = vmatpush3.msra.mxu0 %v2595_v39  ;;  %2048 = vmatpush3.msra.mxu1 %v2638_v27 }
 0x1b0   : > { %2006 = vmatprep.subr.mxu0 %v2243_v1  ;;  %2049 = vmatprep.subr.mxu1 %v2243_v1 }
 0x1b1   : > { %2007 = vmatpush3.msra.mxu0 %v2609_v53  ;;  %2050 = vmatpush3.msra.mxu1 %v2651_v37 }
 0x1b2   : > { %2008 = vmatprep.subr.mxu0 %v2243_v1  ;;  %2051 = vmatprep.subr.mxu1 %v2243_v1 }
 0x1b3   : > { %2009 = vmatpush3.msra.mxu0 %v2626_v17  ;;  %2052 = vmatpush3.msra.mxu1 %v2669_v51 }
 0x1b4   : > { %2010 = vmatprep.subr.mxu0 %v2243_v1  ;;  %2053 = vmatprep.subr.mxu1 %v2243_v1 }
 0x1b5   : > { %2011 = vmatpush3.msra.mxu0 %v2636_v26  ;;  %2054 = vmatpush3.msra.mxu1 %v2685_v61 }
 0x1b6   : > { %2012 = vmatprep.subr.mxu0 %v2243_v1  ;;  %2055 = vmatprep.subr.mxu1 %v2243_v1 }
 0x1b7   : > { %2013 = vmatpush3.msra.mxu0 %v2649_v36  ;;  %2056 = vmatpush3.msra.mxu1 %v2696_v7 }
 0x1b8   : > { %2014 = vmatprep.subr.mxu0 %v2243_v1  ;;  %2057 = vmatprep.subr.mxu1 %v2243_v1 }
 0x1b9   : > { %2015 = vmatpush3.msra.mxu0 %v2667_v49  ;;  %2058 = vmatpush3.msra.mxu1 %v2713_v13 }
 0x1ba   : > { %2016 = vmatprep.subr.mxu0 %v2243_v1  ;;  %2059 = vmatprep.subr.mxu1 %v2243_v1 }
 0x1bb   : > { %2017 = vmatpush3.msra.mxu0 %v2682_v58  ;;  %2060 = vmatpush3.msra.mxu1 %v2726_v33 }
 0x1bc   : > { %2018 = vmatprep.subr.mxu0 %v2243_v1  ;;  %2061 = vmatprep.subr.mxu1 %v2243_v1 }
 0x1bd   : > { %2019 = vmatpush3.msra.mxu0 %v2700_v8  ;;  %2062 = vmatpush3.msra.mxu1 %v2744_v59 }
 0x1be   : > { %2020 = vmatprep.subr.mxu0 %v2243_v1  ;;  %2063 = vmatprep.subr.mxu1 %v2243_v1 }
 0x1bf   : > { %2021 = vmatpush3.msra.mxu0 %v2711_v12  ;;  %2064 = vmatpush3.msra.mxu1 %v2760_v38 }
 0x1c0   : > { %2022 = vmatprep.subr.mxu0 %v2243_v1  ;;  %2065 = vmatprep.subr.mxu1 %v2243_v1 }
 0x1c1   : > { %2023 = vmatpush3.msra.mxu0 %v2724_v23  ;;  %2066 = vmatpush3.msra.mxu1 %v2771_v44 }
 0x1c2   : > { %2024 = vmatprep.subr.mxu0 %v2243_v1  ;;  %2068 = vmatmul.mubr.f32.vlgmr.msra.gmra.mxu1 %v1009_v47 }
 0x1c3   : > { %2105 = vmatprep.subr.mxu1 %v2243_v1  ;;  %2025 = vmatpush3.msra.mxu0 %v2742_v55 }
 0x1c4   : > { %2106 = vmatpush3.msra.mxu1 %v2564_v18  ;;  %2026 = vmatprep.subr.mxu0 %v2243_v1  ;;  %v3010_v18 = vand.u32 4294901760, %v2742_v55 }
 0x1c5   : > { %2107 = vmatprep.subr.mxu1 %v2243_v1  ;;  %2027 = vmatpush3.msra.mxu0 %v2757_v30 }
 0x1c6   : > { %2108 = vmatpush3.msra.mxu1 %v2572_v22  ;;  %2028 = vmatprep.subr.mxu0 %v2243_v1  ;;  %v3012_v22 = vand.u32 4294901760, %v2775_v56 }
 0x1c7   : > { %2109 = vmatprep.subr.mxu1 %v2243_v1  ;;  %2029 = vmatpush3.msra.mxu0 %v2775_v56 }
 0x1c8   : > { %2110 = vmatpush3.msra.mxu1 %v2583_v32  ;;  %2030 = vmatprep.subr.mxu0 %v2243_v1 }
 0x1c9   : > { %2111 = vmatprep.subr.mxu1 %v2243_v1  ;;  %2031 = vmatpush3.msra.mxu0 %v2783_v3 }
 0x1ca   : > { %2032 = vmatprep.mubr.msk.f32.mxu0 %vm2244_vm0, %v2243_v1  ;;  %2112 = vmatpush3.msra.mxu1 %v2597_v42 }
 0x1cb   : > { %2033 = vmatmul.mubr.f32.vlgmr.msra.gmra.mxu0 %v2804_v60  ;;  %2070 = vmatprep.subr.mxu0 %v2243_v1 }
 0x1cc   : > { %2113 = vmatprep.subr.mxu1 %v2243_v1  ;;  %2071 = vmatpush3.msra.mxu0 %v1020_v24  ;;  %v3013_v24 = vand.u32 4294901760, %v2783_v3 }
 0x1cd   : > { %2114 = vmatpush3.msra.mxu1 %v2612_v54  ;;  %2072 = vmatprep.subr.mxu0 %v2243_v1 }
 0x1ce   : > { %2115 = vmatprep.subr.mxu1 %v2243_v1  ;;  %2073 = vmatpush3.msra.mxu0 %v1027_v35 }
 0x1cf   : > { %2116 = vmatpush3.msra.mxu1 %v2622_v16  ;;  %2074 = vmatprep.subr.mxu0 %v2243_v1 }
 0x1d0   : > { %2117 = vmatprep.subr.mxu1 %v2243_v1  ;;  %2075 = vmatpush3.msra.mxu0 %v1034_v50 }
 0x1d1   : > { %2118 = vmatpush3.msra.mxu1 %v2638_v27  ;;  %2076 = vmatprep.subr.mxu0 %v2243_v1 }
 0x1d2   : > { %2119 = vmatprep.subr.mxu1 %v2243_v1  ;;  %2077 = vmatpush3.msra.mxu0 %v1041_v63  ;;  %v1655_v63 = vld [vmem:[%s3002_s3] ss:$0 sm:$0xff] }
 0x1d3   : > { %2120 = vmatpush3.msra.mxu1 %v2651_v37  ;;  %2078 = vmatprep.subr.mxu0 %v2243_v1 }
 0x1d4   : > { %2121 = vmatprep.subr.mxu1 %v2243_v1  ;;  %2079 = vmatpush3.msra.mxu0 %v1048_v28 }
 0x1d5   : > { %2122 = vmatpush3.msra.mxu1 %v2669_v51  ;;  %2080 = vmatprep.subr.mxu0 %v2243_v1 }
 0x1d6   : > { %2123 = vmatprep.subr.mxu1 %v2243_v1  ;;  %2081 = vmatpush3.msra.mxu0 %v1055_v31 }
 0x1d7   : > { %2124 = vmatpush3.msra.mxu1 %v2685_v61  ;;  %2082 = vmatprep.subr.mxu0 %v2243_v1 }
 0x1d8   : > { %2125 = vmatprep.subr.mxu1 %v2243_v1  ;;  %2083 = vmatpush3.msra.mxu0 %v1062_v46 }
 0x1d9   : > { %2126 = vmatpush3.msra.mxu1 %v2696_v7  ;;  %2084 = vmatprep.subr.mxu0 %v2243_v1 }
 0x1da   : > { %2127 = vmatprep.subr.mxu1 %v2243_v1  ;;  %2085 = vmatpush3.msra.mxu0 %v1069_v57 }
 0x1db   : > { %2128 = vmatpush3.msra.mxu1 %v2713_v13  ;;  %2086 = vmatprep.subr.mxu0 %v2243_v1 }
 0x1dc   : > { %2129 = vmatprep.subr.mxu1 %v2243_v1  ;;  %2087 = vmatpush3.msra.mxu0 %v1076_v5 }
 0x1dd   : > { %2130 = vmatpush3.msra.mxu1 %v2726_v33  ;;  %2088 = vmatprep.subr.mxu0 %v2243_v1 }
 0x1de   : > { %2131 = vmatprep.subr.mxu1 %v2243_v1  ;;  %2089 = vmatpush3.msra.mxu0 %v1083_v14 }
 0x1df   : > { %2132 = vmatpush3.msra.mxu1 %v2744_v59  ;;  %2090 = vmatprep.subr.mxu0 %v2243_v1 }
 0x1e0   : > { %2133 = vmatprep.subr.mxu1 %v2243_v1  ;;  %2091 = vmatpush3.msra.mxu0 %v1090_v19 }
 0x1e1   : > { %2134 = vmatpush3.msra.mxu1 %v2760_v38  ;;  %2092 = vmatprep.subr.mxu0 %v2243_v1 }
 0x1e2   : > { %2135 = vmatprep.subr.mxu1 %v2243_v1  ;;  %2093 = vmatpush3.msra.mxu0 %v1097_v48 }
 0x1e3   : > { %2136 = vmatpush3.msra.mxu1 %v2771_v44  ;;  %2137 = vmatprep.mubr.msk.f32.mxu1 %vm2244_vm0, %v2243_v1 }
 0x1e4   : > { %2094 = vmatprep.subr.mxu0 %v2243_v1  ;;  %2138 = vmatmul.mubr.f32.vlgmr.msra.gmra.mxu1 %v2801_v29 }
 0x1e5   : > { %2095 = vmatpush3.msra.mxu0 %v3010_v18  ;;  %2102 = vmatprep.mubr.msk.f32.mxu0 %vm2244_vm0, %v2243_v1 }
 0x1e6   : > { %2096 = vmatprep.subr.mxu0 %v2243_v1 }
 0x1e7   : > { %2097 = vmatpush3.msra.mxu0 %v3011_v20 }
 0x1e8   : > { %2098 = vmatprep.subr.mxu0 %v2243_v1 }
 0x1e9   : > { %2099 = vmatpush3.msra.mxu0 %v3012_v22 }
 0x1ea   : > { %2100 = vmatprep.subr.mxu0 %v2243_v1 }
 0x1eb   : > { %2101 = vmatpush3.msra.mxu0 %v3013_v24 }
 0x1ec   : > { %2103 = vmatmul.mubr.f32.vlgmr.msra.gmra.mxu0 %v2801_v29 }
 0x262   : > { %v1164_v25 = vpop.f32.mrf.mxu1 }
 0x264   : > { %v1999_v32 = vpop.f32.mrf.mxu1 }
 0x26a   : > { %v1013_v35 = vpop.f32.mrf.mxu0 }
 0x26b   : > { %v1014_v16 = vadd.f32 %v1655_v63, %v1013_v35 }
 0x26c   : > { %v1964_v39 = vpop.f32.mrf.mxu0 }
 0x26d   : > { %v1165_v17 = vadd.f32 %v1164_v25, %v1014_v16 }
 0x282   : > { %v1357_v42 = vpop.f32.mrf.mxu1 }
 0x284   : > { %v2069_v50 = vpop.f32.mrf.mxu1 }
 0x28b   : > { %v1268_v53 = vpop.f32.mrf.mxu0 }
 0x28c   : > { %v1269_v27 = vadd.f32 %v1268_v53, %v1165_v17 }
 0x28d   : > { %v2034_v54 = vpop.f32.mrf.mxu0 }
 0x28e   : > { %v1358_v28 = vadd.f32 %v1357_v42, %v1269_v27 }
 0x2a4   : > { %v1563_v1 = vpop.f32.mrf.mxu1 }
 0x2a6   : > { %v2139_v26 = vpop.f32.mrf.mxu1 }
 0x2ac   : > { %v1476_v31 = vpop.f32.mrf.mxu0 }
 0x2ad   : > { %v1477_v36 = vadd.f32 %v1476_v31, %v1358_v28 }
 0x2ae   : > { %v2104_v37 = vpop.f32.mrf.mxu0 }
 0x2af   : > { %v1564_v46 = vadd.f32 %v1563_v1, %v1477_v36 }
 0x2b1   : > { %1567 = vst [vmem:[%s188_s8] sm:$0xff] %v1564_v46 }
 0x2b2   : > { %2194 = shalt.err (!%p2191_p3)
}
 0x2b3   : > { %s2195_s23 = scalar_lea.hbm %s1580_s12, 128  ;;  %s2199_s29 = scalar_lea.hbm %s3003_s4, 512 }
 0x2b4   : > { %p2196_p4 = scmp.ne.s32.totalorder %s1580_s12, %s2195_s23  ;;  %p2200_p9 = scmp.lt.s32.totalorder %s1580_s12, %s3003_s4 }
 0x2b5   : > { %p2201_p10 = scmp.lt.s32.totalorder %s2199_s29, %s2195_s23 }
 0x2b6   : > { %p2197_p7 = pnand %p2196_p4, %p2309_p5 }
 0x2b7   : > { %p2202_p11 = por %p2201_p10, %p2200_p9 }
 0x2b8   : > { %p2198_p8 = pneg %p2197_p7 }
 0x2ba   : > { %p2203_p12 = pnand %p2202_p11, %p2198_p8 }
 0x2bc   : > { %2206 = shalt.err (!%p2203_p12)
}
 0x2bd   : > { %2140 = dma.vmem_to_hbm [thread:$0]  (%p2309_p5), %s1583_s9, 128, %s1580_s12, %s1569_s13  }
 0x2be PF: > { %p2146_p13 = scmp.ge.s32.totalorder %s2241_s18, 2  ;;  %s1594_s6 = sand.u32 1, %s2229_s15  }
 0x2bf   : > { %s1595_s7 = scalar_lea.sflag [#allocation3], %s1594_s6 }
 0x2c0   : > { %p2143_p0 = pnand %p2146_p13, %p2313_p6 }
 0x2c2   : > { %p2144_p1 = pneg %p2143_p0 }
 0x2c4   : > { %2224 = dma.done.wait (%p2144_p1), %s1595_s7, 128  }
 0x2c5   : > { %2226 = vsyncadd (%p2144_p1), %s1595_s7, 4294967168  ;;  %p14_p2 = scmp.ge.s32.totalorder %s2296_s21, 6   ;;  %s3014_s15 = smov %s2233_s16 }
 0x2c6   : > { %s3015_s16 = smov %s2237_s17  ;;  %s3016_s17 = smov %s2307_s24 }
 0x2c7   : > { %s3017_s18 = smov %s2296_s21  ;;  %16 = sbr.rel (!%p14_p2) target bundleno = 3 (0x3), region = 71 }
 0x2cc   :  { %1600 = vsyncpa [#allocation3], 1 }
 0x2cd   :  { %1602 = vsyncpa [#allocation3 + $0x1], 1 }

</bundles_post_ra>
